<compile_context>
chip_gen: v5e
topology: v5e:2x2
jax: 0.10.0
libtpu: 0.0.40
codegen_flags: <defaults>
</compile_context>

<pallas_src>
import jax
import jax.numpy as jnp
from jax import lax
from jax.experimental import pallas as pl
from jax.experimental.pallas import tpu as pltpu

INPUT_SIZE = 26       # vocab size
EMBEDDING_SIZE = 10
HIDDEN_SIZE = 26
NUM_CLASSES = 26
BATCH_SIZE = 1


def rnn_fc_kernel(ids_ref, proj_ref, whh_ref, wfc_ref, bfc_ref, out_ref):
    """Full-sequence RNN recurrence + Linear head in one call.

    ids_ref : (S, 1) int32   token indices
    proj_ref: (V, H) f32     emb_table @ W_ih^T + (b_ih + b_hh)   (fused lookup table)
    whh_ref : (H, H) f32     W_hh^T
    wfc_ref : (H, C) f32     W_fc^T
    bfc_ref : (1, C) f32
    out_ref : (1, S, C) f32
    """
    seq_len = ids_ref.shape[0]
    vocab = proj_ref.shape[0]
    hidden = whh_ref.shape[1]

    # Fused embedding gather + input projection + biases for ALL timesteps:
    # one_hot(ids) @ proj_table -> (S, H); one MXU op, outside the recurrence.
    ids = ids_ref[...]                                              # (S, 1)
    iota_v = lax.broadcasted_iota(jnp.int32, (seq_len, vocab), 1)   # (S, V)
    one_hot = (ids == iota_v).astype(jnp.float32)                   # (S, V)
    pre = jnp.dot(one_hot, proj_ref[...],
                  preferred_element_type=jnp.float32)               # (S, H)

    whh = whh_ref[...]                                              # resident across the loop

    # Serial recurrence: h carried in vregs, loop fully unrolled (seq_len small & static).
    h = jnp.zeros((1, hidden), jnp.float32)
    hs = []
    for t in range(seq_len):
        h = jnp.tanh(pre[t:t + 1, :]
                     + jnp.dot(h, whh, preferred_element_type=jnp.float32))
        hs.append(h)
    h_all = jnp.concatenate(hs, axis=0)                             # (S, H)

    # Linear head hoisted out of the loop: one matmul + one full-block store.
    logits = (jnp.dot(h_all, wfc_ref[...], preferred_element_type=jnp.float32)
              + bfc_ref[...])                                       # (S, C)
    out_ref[0] = logits.astype(out_ref.dtype)


def init_params(key):
    """Deterministic parameter init mirroring the PyTorch module's shapes."""
    ks = jax.random.split(key, 7)
    bound_rnn = 1.0 / jnp.sqrt(HIDDEN_SIZE)
    bound_fc = 1.0 / jnp.sqrt(HIDDEN_SIZE)
    params = {
        "emb_table": jax.random.normal(ks[0], (INPUT_SIZE, EMBEDDING_SIZE), jnp.float32),
        "w_ih": jax.random.uniform(ks[1], (HIDDEN_SIZE, EMBEDDING_SIZE), jnp.float32,
                                   -bound_rnn, bound_rnn),
        "w_hh": jax.random.uniform(ks[2], (HIDDEN_SIZE, HIDDEN_SIZE), jnp.float32,
                                   -bound_rnn, bound_rnn),
        "b_ih": jax.random.uniform(ks[3], (HIDDEN_SIZE,), jnp.float32,
                                   -bound_rnn, bound_rnn),
        "b_hh": jax.random.uniform(ks[4], (HIDDEN_SIZE,), jnp.float32,
                                   -bound_rnn, bound_rnn),
        "w_fc": jax.random.uniform(ks[5], (NUM_CLASSES, HIDDEN_SIZE), jnp.float32,
                                   -bound_fc, bound_fc),
        "b_fc": jax.random.uniform(ks[6], (NUM_CLASSES,), jnp.float32,
                                   -bound_fc, bound_fc),
    }
    return params


def prepare_params(params):
    """One-time derivation of kernel-ready parameters (transposes, fused biases/table)."""
    proj_table = (params["emb_table"] @ params["w_ih"].T
                  + (params["b_ih"] + params["b_hh"]))              # (V, H)
    return {
        "proj_table": proj_table.astype(jnp.float32),               # (V, H)
        "w_hh_t": params["w_hh"].T.astype(jnp.float32),             # (H, H)
        "w_fc_t": params["w_fc"].T.astype(jnp.float32),             # (H, C)
        "b_fc": params["b_fc"].reshape(1, -1).astype(jnp.float32),  # (1, C)
    }


def network_forward(x_idx, prepared):
    """x_idx: (1, S) int32 token indices. Returns (1, S, C) f32, matching PyTorch layout."""
    seq_len = x_idx.shape[1]
    ids = x_idx.reshape(seq_len, 1).astype(jnp.int32)               # (S, 1)

    vmem_spec = pl.BlockSpec(memory_space=pltpu.MemorySpace.VMEM)
    out = pl.pallas_call(
        rnn_fc_kernel,
        out_shape=jax.ShapeDtypeStruct((1, seq_len, NUM_CLASSES), jnp.float32),
        in_specs=[vmem_spec] * 5,
        out_specs=vmem_spec,
    )(
        ids,
        prepared["proj_table"],
        prepared["w_hh_t"],
        prepared["w_fc_t"],
        prepared["b_fc"],
    )
    return out                                                      # (1, S, C)


def network_forward_ref(x_idx, params):
    """Pure-JAX reference (raw parameters) for correctness checking."""
    emb = jnp.take(params["emb_table"], x_idx[0], axis=0)           # (S, E)

    def step(h, x_t):
        h_new = jnp.tanh(x_t @ params["w_ih"].T + params["b_ih"]
                         + h @ params["w_hh"].T + params["b_hh"])
        return h_new, h_new

    h0 = jnp.zeros((HIDDEN_SIZE,), jnp.float32)
    _, hs = lax.scan(step, h0, emb)                                 # (S, H)
    out = hs @ params["w_fc"].T + params["b_fc"]                    # (S, C)
    return out[None, :, :]                                          # (1, S, C)


if __name__ == "__main__":
    key = jax.random.PRNGKey(0)
    k_params, k_x = jax.random.split(key)

    params = init_params(k_params)
    prepared = prepare_params(params)

    seq_len = 8
    x = jax.random.randint(k_x, (BATCH_SIZE, seq_len), 0, INPUT_SIZE, dtype=jnp.int32)

    y = network_forward(x, prepared)
    jax.block_until_ready(y)

    y_ref = network_forward_ref(x, params)
    assert y.shape == (BATCH_SIZE, seq_len, NUM_CLASSES), y.shape
    assert jnp.allclose(y, y_ref, rtol=1e-4, atol=1e-4), \
        f"max abs err {jnp.max(jnp.abs(y - y_ref))}"

    print("KERNEL_OK")
</pallas_src>

<mosaic_0001>
module attributes {stable_mosaic.version = 11 : i64} {
  func.func @rnn_fc_kernel(%arg0: memref<8x1xi32, #tpu.memory_space<vmem>>, %arg1: memref<26x26xf32, #tpu.memory_space<vmem>>, %arg2: memref<26x26xf32, #tpu.memory_space<vmem>>, %arg3: memref<26x26xf32, #tpu.memory_space<vmem>>, %arg4: memref<1x26xf32, #tpu.memory_space<vmem>>, %arg5: memref<1x8x26xf32, #tpu.memory_space<vmem>>) attributes {dimension_semantics = [], scalar_prefetch = 0 : i64, scratch_operands = 0 : i64, tpu.core_type = #tpu.core_type<tc>} {
    %c0 = arith.constant 0 : index
    %c0_0 = arith.constant 0 : index
    %0 = vector.load %arg0[%c0, %c0_0] : memref<8x1xi32, #tpu.memory_space<vmem>>, vector<8x1xi32>
    %1 = tpu.iota {dimensions = array<i32: 1>} : vector<8x26xi32>
    %2 = vector.broadcast %0 : vector<8x1xi32> to vector<8x26xi32>
    %3 = arith.cmpi eq, %2, %1 : vector<8x26xi32>
    %4 = arith.extui %3 : vector<8x26xi1> to vector<8x26xi32>
    %5 = arith.sitofp %4 : vector<8x26xi32> to vector<8x26xf32>
    %c0_1 = arith.constant 0 : index
    %c0_2 = arith.constant 0 : index
    %6 = vector.load %arg1[%c0_1, %c0_2] : memref<26x26xf32, #tpu.memory_space<vmem>>, vector<26x26xf32>
    %cst = arith.constant dense<0.000000e+00> : vector<8x26xf32>
    %7 = tpu.matmul %5, %6, %cst {dimension_numbers = #tpu.dot_dimension_numbers<[1], [0], [0], [1], [0, 0, 1, 1], [], []>} : vector<8x26xf32>, vector<26x26xf32>, vector<8x26xf32> -> vector<8x26xf32>
    %c0_3 = arith.constant 0 : index
    %c0_4 = arith.constant 0 : index
    %8 = vector.load %arg2[%c0_3, %c0_4] : memref<26x26xf32, #tpu.memory_space<vmem>>, vector<26x26xf32>
    %cst_5 = arith.constant 0.000000e+00 : f32
    %9 = vector.broadcast %cst_5 : f32 to vector<1x26xf32>
    %10 = vector.extract_strided_slice %7 {offsets = [0, 0], sizes = [1, 26], strides = [1, 1]} : vector<8x26xf32> to vector<1x26xf32>
    %cst_6 = arith.constant dense<0.000000e+00> : vector<1x26xf32>
    %11 = tpu.matmul %9, %8, %cst_6 {dimension_numbers = #tpu.dot_dimension_numbers<[1], [0], [0], [1], [0, 0, 1, 1], [], []>} : vector<1x26xf32>, vector<26x26xf32>, vector<1x26xf32> -> vector<1x26xf32>
    %12 = arith.addf %10, %11 : vector<1x26xf32>
    %13 = math.tanh %12 : vector<1x26xf32>
    %14 = vector.extract_strided_slice %7 {offsets = [1, 0], sizes = [1, 26], strides = [1, 1]} : vector<8x26xf32> to vector<1x26xf32>
    %cst_7 = arith.constant dense<0.000000e+00> : vector<1x26xf32>
    %15 = tpu.matmul %13, %8, %cst_7 {dimension_numbers = #tpu.dot_dimension_numbers<[1], [0], [0], [1], [0, 0, 1, 1], [], []>} : vector<1x26xf32>, vector<26x26xf32>, vector<1x26xf32> -> vector<1x26xf32>
    %16 = arith.addf %14, %15 : vector<1x26xf32>
    %17 = math.tanh %16 : vector<1x26xf32>
    %18 = vector.extract_strided_slice %7 {offsets = [2, 0], sizes = [1, 26], strides = [1, 1]} : vector<8x26xf32> to vector<1x26xf32>
    %cst_8 = arith.constant dense<0.000000e+00> : vector<1x26xf32>
    %19 = tpu.matmul %17, %8, %cst_8 {dimension_numbers = #tpu.dot_dimension_numbers<[1], [0], [0], [1], [0, 0, 1, 1], [], []>} : vector<1x26xf32>, vector<26x26xf32>, vector<1x26xf32> -> vector<1x26xf32>
    %20 = arith.addf %18, %19 : vector<1x26xf32>
    %21 = math.tanh %20 : vector<1x26xf32>
    %22 = vector.extract_strided_slice %7 {offsets = [3, 0], sizes = [1, 26], strides = [1, 1]} : vector<8x26xf32> to vector<1x26xf32>
    %cst_9 = arith.constant dense<0.000000e+00> : vector<1x26xf32>
    %23 = tpu.matmul %21, %8, %cst_9 {dimension_numbers = #tpu.dot_dimension_numbers<[1], [0], [0], [1], [0, 0, 1, 1], [], []>} : vector<1x26xf32>, vector<26x26xf32>, vector<1x26xf32> -> vector<1x26xf32>
    %24 = arith.addf %22, %23 : vector<1x26xf32>
    %25 = math.tanh %24 : vector<1x26xf32>
    %26 = vector.extract_strided_slice %7 {offsets = [4, 0], sizes = [1, 26], strides = [1, 1]} : vector<8x26xf32> to vector<1x26xf32>
    %cst_10 = arith.constant dense<0.000000e+00> : vector<1x26xf32>
    %27 = tpu.matmul %25, %8, %cst_10 {dimension_numbers = #tpu.dot_dimension_numbers<[1], [0], [0], [1], [0, 0, 1, 1], [], []>} : vector<1x26xf32>, vector<26x26xf32>, vector<1x26xf32> -> vector<1x26xf32>
    %28 = arith.addf %26, %27 : vector<1x26xf32>
    %29 = math.tanh %28 : vector<1x26xf32>
    %30 = vector.extract_strided_slice %7 {offsets = [5, 0], sizes = [1, 26], strides = [1, 1]} : vector<8x26xf32> to vector<1x26xf32>
    %cst_11 = arith.constant dense<0.000000e+00> : vector<1x26xf32>
    %31 = tpu.matmul %29, %8, %cst_11 {dimension_numbers = #tpu.dot_dimension_numbers<[1], [0], [0], [1], [0, 0, 1, 1], [], []>} : vector<1x26xf32>, vector<26x26xf32>, vector<1x26xf32> -> vector<1x26xf32>
    %32 = arith.addf %30, %31 : vector<1x26xf32>
    %33 = math.tanh %32 : vector<1x26xf32>
    %34 = vector.extract_strided_slice %7 {offsets = [6, 0], sizes = [1, 26], strides = [1, 1]} : vector<8x26xf32> to vector<1x26xf32>
    %cst_12 = arith.constant dense<0.000000e+00> : vector<1x26xf32>
    %35 = tpu.matmul %33, %8, %cst_12 {dimension_numbers = #tpu.dot_dimension_numbers<[1], [0], [0], [1], [0, 0, 1, 1], [], []>} : vector<1x26xf32>, vector<26x26xf32>, vector<1x26xf32> -> vector<1x26xf32>
    %36 = arith.addf %34, %35 : vector<1x26xf32>
    %37 = math.tanh %36 : vector<1x26xf32>
    %38 = vector.extract_strided_slice %7 {offsets = [7, 0], sizes = [1, 26], strides = [1, 1]} : vector<8x26xf32> to vector<1x26xf32>
    %cst_13 = arith.constant dense<0.000000e+00> : vector<1x26xf32>
    %39 = tpu.matmul %37, %8, %cst_13 {dimension_numbers = #tpu.dot_dimension_numbers<[1], [0], [0], [1], [0, 0, 1, 1], [], []>} : vector<1x26xf32>, vector<26x26xf32>, vector<1x26xf32> -> vector<1x26xf32>
    %40 = arith.addf %38, %39 : vector<1x26xf32>
    %41 = math.tanh %40 : vector<1x26xf32>
    %42 = tpu.concatenate %13, %17, %21, %25, %29, %33, %37, %41 in 0 : vector<1x26xf32>, vector<1x26xf32>, vector<1x26xf32>, vector<1x26xf32>, vector<1x26xf32>, vector<1x26xf32>, vector<1x26xf32>, vector<1x26xf32> -> vector<8x26xf32>
    %c0_14 = arith.constant 0 : index
    %c0_15 = arith.constant 0 : index
    %43 = vector.load %arg3[%c0_14, %c0_15] : memref<26x26xf32, #tpu.memory_space<vmem>>, vector<26x26xf32>
    %cst_16 = arith.constant dense<0.000000e+00> : vector<8x26xf32>
    %44 = tpu.matmul %42, %43, %cst_16 {dimension_numbers = #tpu.dot_dimension_numbers<[1], [0], [0], [1], [0, 0, 1, 1], [], []>} : vector<8x26xf32>, vector<26x26xf32>, vector<8x26xf32> -> vector<8x26xf32>
    %c0_17 = arith.constant 0 : index
    %c0_18 = arith.constant 0 : index
    %45 = vector.load %arg4[%c0_17, %c0_18] : memref<1x26xf32, #tpu.memory_space<vmem>>, vector<1x26xf32>
    %46 = vector.broadcast %45 : vector<1x26xf32> to vector<8x26xf32>
    %47 = arith.addf %44, %46 : vector<8x26xf32>
    %c0_19 = arith.constant 0 : index
    %c0_20 = arith.constant 0 : index
    %c0_21 = arith.constant 0 : index
    %48 = vector.load %arg5[%c0_19, %c0_20, %c0_21] : memref<1x8x26xf32, #tpu.memory_space<vmem>>, vector<1x8x26xf32>
    %49 = vector.shape_cast %48 : vector<1x8x26xf32> to vector<8x26xf32>
    %50 = vector.shape_cast %47 : vector<8x26xf32> to vector<1x8x26xf32>
    tpu.vector_store %arg5[%c0_19, %c0_20, %c0_21], %50 {strides = array<i32>} : memref<1x8x26xf32, #tpu.memory_space<vmem>>, vector<1x8x26xf32>,
    return
  }
}

</mosaic_0001>

<bundles_post_ra>
// kernel: tpu_custom_call.1
= control target key start
LH: loop header
LB: loop body
LE: loop exit
PB: predicated region body
PF: predicated region fallthrough
CT: control target
= control target key end

     0   :  { %10 = vsyncpa [#allocation3], 0  ;;  %s644_s0 = inlined_call_operand.vmem [shape: s32[8,1], index: 0, kind: input, shape index: {}]   ;;  %s645_s1 = inlined_call_operand.hbm [shape: f32[26,26], index: 1, kind: input, shape index: {}]   ;;  %s646_s2 = inlined_call_operand.hbm [shape: f32[26,26], index: 2, kind: input, shape index: {}]   ;;  %s647_s3 = inlined_call_operand.hbm [shape: f32[26,26], index: 3, kind: input, shape index: {}]   ;;  %s648_s4 = inlined_call_operand.vmem [shape: f32[1,26], index: 4, kind: input, shape index: {}]   ;;  %s649_s5 = inlined_call_operand.hbm [shape: f32[1,8,26], index: 5, kind: output, shape index: {}]  }
   0x1   :  { %11 = vsyncpa [#allocation6], 0 }
   0x2   :  { %12 = vsyncpa [#allocation4], 0  ;;  %s32_s20 = sshll.u32 %s646_s2, 4  ;;  %s557_s21 = smov [#allocation5]   ;;  %s33_s20 = int_to_ptr.hbm [resolvable:$true] %s32_s20 }
   0x3   :  { %s34_s22 = sshll.u32 %s557_s21, 4  ;;  %s19_s25 = sshll.u32 %s645_s1, 4  ;;  %s35_s22 = int_to_ptr.vmem [resolvable:$true] %s34_s22  ;;  %s20_s25 = int_to_ptr.hbm [resolvable:$true] %s19_s25 }
   0x4   :  { %s558_s26 = smov 128   ;;  %s559_s27 = smov 8  }
   0x5   :  { %40 = dma.hbm_to_vmem [thread:$0]  %s33_s20, 512, %s35_s22, [#allocation6], %s558_s26, %s558_s26, %s559_s27  }
   0x6   :  { %s560_s28 = smov [#allocation2]   ;;  %s45_s7 = sshll.u32 %s647_s3, 4  ;;  %s46_s7 = int_to_ptr.hbm [resolvable:$true] %s45_s7 }
   0x7   :  { %s21_s29 = sshll.u32 %s560_s28, 4  ;;  %s561_s2 = smov [#allocation7]   ;;  %s22_s29 = int_to_ptr.vmem [resolvable:$true] %s21_s29 }
   0x8   :  { %27 = dma.hbm_to_vmem [thread:$0]  %s20_s25, 512, %s22_s29, [#allocation3], %s558_s26, %s558_s26, %s559_s27  }
   0x9   :  { %s47_s8 = sshll.u32 %s561_s2, 4  ;;  %s48_s8 = int_to_ptr.vmem [resolvable:$true] %s47_s8 }
   0xa   :  { %53 = dma.hbm_to_vmem [thread:$0]  %s46_s7, 512, %s48_s8, [#allocation6], %s558_s26, %s558_s26, %s559_s27  }
   0xb   :  { %551 = dma.done.wait [#allocation3], 512  }
   0xc   :  { %552 = vsyncadd [#allocation3], 4294966784 }
   0xd   :  { %553 = dma.done.wait [#allocation6], 1024  }
   0xe   :  { %554 = vsyncadd [#allocation6], 4294966272  ;;  %v562_v0 = vmov 0   ;;  %vm85_vm0 = vcmask 1041408   ;;  %v68_v1 = vld [vmem:[%s644_s0] sm:$0xff]  ;;  %v79_v4 = vld [vmem:[#allocation2 + $0x10] sm:$0xff]  ;;  %v69_v11 = vlaneseq }
   0xf   :  { %437 = vset.pattern.permute.xlu0 %v562_v0  ;;  %v80_v2 = vld [vmem:[#allocation2 + $0x18] sm:$0x3]  ;;  %v111_v5 = vld [vmem:[#allocation5 + $0x10] sm:$0xff]  ;;  %v78_v6 = vld [vmem:[#allocation2 + $0x8] sm:$0xff]  ;;  %v563_v10 = vmov 0.0   ;;  %vm81_vm1 = vcmask 211968  }
  0x10   :  { %v112_v3 = vld [vmem:[#allocation5 + $0x18] sm:$0x3]  ;;  %72 = vperm.xlu0 %437, %v68_v1   ;;  %410 = vmatpush.msk.msra.mxu0 %vm85_vm0, %v80_v2  ;;  %v110_v7 = vld [vmem:[#allocation5 + $0x8] sm:$0xff]  ;;  %v77_v8 = vld [vmem:[#allocation2] sm:$0xff]  ;;  %v70_v12 = vand.u32 127, %v69_v11  ;;  %vm343_vm3 = vcmask 1040384  }
  0x11   :  { %412 = vmatpush.msk.msra.mxu1 %vm85_vm0, %v112_v3  ;;  %413 = vmatpush.msk.msra.mxu2 %vm85_vm0, %v112_v3  ;;  %v109_v9 = vld [vmem:[#allocation5] sm:$0xff]  ;;  %vm346_vm4 = vcmask 1042432   ;;  %vm348_vm5 = vcmask 1043456   ;;  %vm350_vm6 = vcmask 1044480   ;;  %vm352_vm7 = vcmask 1045504   ;;  %v358_v56 = vld [vmem:[#allocation7 + $0x10] sm:$0xff] }
  0x12   :  { %102 = vmatpush.msra.mxu0 %v79_v4  ;;  %415 = vmatpush.msk.msra.mxu3 %vm85_vm0, %v112_v3  ;;  %v359_v55 = vld [vmem:[#allocation7 + $0x18] sm:$0x3]  ;;  %v357_v57 = vld [vmem:[#allocation7 + $0x8] sm:$0xff]  ;;  %v356_v58 = vld [vmem:[#allocation7] sm:$0xff]  ;;  %vm354_vm8 = vcmask 1046528   ;;  %s564_s10 = smov [#allocation8]  }
  0x13   :  { %132 = vmatpush.msra.mxu1 %v111_v5  ;;  %157 = vmatpush.msra.mxu2 %v111_v5  ;;  %v438_v0 = vld [vmem:[%s648_s4] ss:$0 sm:$0xff]  ;;  %s396_s11 = sshll.u32 %s564_s10, 4  ;;  %s398_s14 = sshll.u32 %s649_s5, 4  ;;  %s397_s11 = int_to_ptr.vmem [resolvable:$true] %s396_s11  ;;  %s399_s14 = int_to_ptr.hbm [resolvable:$true] %s398_s14 }
  0x14   :  { %103 = vmatpush.msra.mxu0 %v78_v6  ;;  %186 = vmatpush.msra.mxu3 %v111_v5 }
  0x15   :  { %133 = vmatpush.msra.mxu1 %v110_v7  ;;  %158 = vmatpush.msra.mxu2 %v110_v7 }
  0x16   :  { %187 = vmatpush.msra.mxu3 %v110_v7  ;;  %104 = vmatpush.msra.mxu0 %v77_v8 }
  0x17   :  { %134 = vmatpush.msra.mxu1 %v109_v9  ;;  %159 = vmatpush.msra.mxu2 %v109_v9 }
  0x18   :  { %135 = vmatmul.f32.vlgmr.msra.gmra.mxu1 %v563_v10  ;;  %188 = vmatpush.msra.mxu3 %v109_v9 }
  0x19   :  { %417 = vmatpush.msk.msrb.mxu0 %vm85_vm0, %v112_v3  ;;  %419 = vmatpush.msk.msrb.mxu1 %vm85_vm0, %v112_v3 }
  0x1a   :  { %421 = vmatpush.msk.msrb.mxu2 %vm85_vm0, %v112_v3  ;;  %423 = vmatpush.msk.msrb.mxu3 %vm85_vm0, %v112_v3 }
  0x1b   :  { %215 = vmatpush.msrb.mxu0 %v111_v5  ;;  %244 = vmatpush.msrb.mxu1 %v111_v5 }
  0x1c   :  { %273 = vmatpush.msrb.mxu2 %v111_v5  ;;  %302 = vmatpush.msrb.mxu3 %v111_v5 }
  0x1d   :  { %216 = vmatpush.msrb.mxu0 %v110_v7  ;;  %245 = vmatpush.msrb.mxu1 %v110_v7 }
  0x1e   :  { %274 = vmatpush.msrb.mxu2 %v110_v7  ;;  %303 = vmatpush.msrb.mxu3 %v110_v7 }
  0x1f   :  { %217 = vmatpush.msrb.mxu0 %v109_v9  ;;  %246 = vmatpush.msrb.mxu1 %v109_v9 }
  0x20   :  { %275 = vmatpush.msrb.mxu2 %v109_v9  ;;  %304 = vmatpush.msrb.mxu3 %v109_v9 }
  0x21   :  { %427 = vmatpush.msk.msra.mxu1 %vm85_vm0, %v359_v55 }
  0x23   :  { %383 = vmatpush.msra.mxu1 %v358_v56 }
  0x25   :  { %384 = vmatpush.msra.mxu1 %v357_v57 }
  0x27   :  { %385 = vmatpush.msra.mxu1 %v356_v58 }
  0x82   :  { %v73_v13 = vpop.permute.xlu0 %72 }
  0x83   :  { %vm74_vm2 = vcmp.eq.s32.totalorder %v73_v13, %v70_v12 }
  0x84   :  { %v409_v14 = vsel %vm74_vm2, 1.0, %v563_v10 }
  0x85   :  { %411 = vmatmul.msk.f32.vlgmr.msra.gmra.mxu0 %vm81_vm1, %v409_v14 }
  0x86   :  { %425 = vmatpush.msk.msra.mxu0 %vm85_vm0, %v112_v3 }
  0x88   :  { %331 = vmatpush.msra.mxu0 %v111_v5 }
  0x8a   :  { %332 = vmatpush.msra.mxu0 %v110_v7 }
  0x8c   :  { %333 = vmatpush.msra.mxu0 %v109_v9 }
  0x95   :  { %v136_v15 = vpop.f32.mrf.mxu1 }
 0x102   :  { %v617_v16 = vpop.f32.mrf.mxu0 }
 0x103   :  { %v139_v17 = vadd.f32 %v136_v15, %v617_v16 }
 0x105   :  { %439 = vtanh.f32 %v139_v17 }
 0x10b   :  { %v440_v18 = vpop.eup %439 }
 0x10c   :  { %414 = vmatmul.msk.f32.vlgmr.msra.gmra.mxu2 %vm81_vm1, %v440_v18 }
 0x18f   :  { %v161_v19 = vpop.f32.mrf.mxu2 }
 0x190   :  { %v165_v20 = vrot.slane %v161_v19, 7 }
 0x192   :  { %v167_v21 = vadd.f32 %v165_v20, %v617_v16 }
 0x194   :  { %441 = vtanh.f32 %v167_v21 }
 0x19a   :  { %v442_v22 = vpop.eup %441 }
 0x19b   :  { %v170_v23 = vrot.slane %v442_v22, 1  ;;  %v344_v28 = vsel %vm343_vm3, %v440_v18, %v442_v22 }
 0x19d   :  { %416 = vmatmul.msk.f32.vlgmr.msra.gmra.mxu3 %vm81_vm1, %v170_v23 }
 0x220   :  { %v190_v24 = vpop.f32.mrf.mxu3 }
 0x221   :  { %v194_v25 = vrot.slane %v190_v24, 6 }
 0x223   :  { %v196_v26 = vadd.f32 %v194_v25, %v617_v16 }
 0x225   :  { %443 = vtanh.f32 %v196_v26 }
 0x22b   :  { %v444_v27 = vpop.eup %443 }
 0x22c   :  { %v199_v29 = vrot.slane %v444_v27, 2  ;;  %v345_v30 = vsel %vm85_vm0, %v344_v28, %v444_v27 }
 0x22e   :  { %418 = vmatmul.msk.f32.vlgmr.msrb.gmra.mxu0 %vm81_vm1, %v199_v29 }
 0x2ab   :  { %v219_v31 = vpop.f32.mrf.mxu0 }
 0x2ac   :  { %v223_v32 = vrot.slane %v219_v31, 5 }
 0x2ae   :  { %v225_v33 = vadd.f32 %v223_v32, %v617_v16 }
 0x2b0   :  { %445 = vtanh.f32 %v225_v33 }
 0x2b6   :  { %v446_v34 = vpop.eup %445 }
 0x2b7   :  { %v228_v35 = vrot.slane %v446_v34, 3  ;;  %v347_v36 = vsel %vm346_vm4, %v345_v30, %v446_v34 }
 0x2b9   :  { %420 = vmatmul.msk.f32.vlgmr.msrb.gmra.mxu1 %vm81_vm1, %v228_v35 }
 0x336   :  { %v248_v37 = vpop.f32.mrf.mxu1 }
 0x337   :  { %v252_v38 = vrot.slane %v248_v37, 4 }
 0x339   :  { %v254_v39 = vadd.f32 %v252_v38, %v617_v16 }
 0x33b   :  { %447 = vtanh.f32 %v254_v39 }
 0x341   :  { %v448_v40 = vpop.eup %447 }
 0x342   :  { %v257_v41 = vrot.slane %v448_v40, 4  ;;  %v349_v42 = vsel %vm348_vm5, %v347_v36, %v448_v40 }
 0x344   :  { %422 = vmatmul.msk.f32.vlgmr.msrb.gmra.mxu2 %vm81_vm1, %v257_v41 }
 0x3c7   :  { %v277_v43 = vpop.f32.mrf.mxu2 }
 0x3c8   :  { %v281_v44 = vrot.slane %v277_v43, 3 }
 0x3ca   :  { %v283_v45 = vadd.f32 %v281_v44, %v617_v16 }
 0x3cc   :  { %449 = vtanh.f32 %v283_v45 }
 0x3d2   :  { %v450_v46 = vpop.eup %449 }
 0x3d3   :  { %v286_v47 = vrot.slane %v450_v46, 5  ;;  %v351_v48 = vsel %vm350_vm6, %v349_v42, %v450_v46 }
 0x3d5   :  { %424 = vmatmul.msk.f32.vlgmr.msrb.gmra.mxu3 %vm81_vm1, %v286_v47 }
 0x458   :  { %v306_v49 = vpop.f32.mrf.mxu3 }
 0x459   :  { %v310_v50 = vrot.slane %v306_v49, 2 }
 0x45b   :  { %v312_v51 = vadd.f32 %v310_v50, %v617_v16 }
 0x45d   :  { %451 = vtanh.f32 %v312_v51 }
 0x463   :  { %v452_v52 = vpop.eup %451 }
 0x464   :  { %v315_v53 = vrot.slane %v452_v52, 6  ;;  %v353_v54 = vsel %vm352_vm7, %v351_v48, %v452_v52 }
 0x466   :  { %426 = vmatmul.msk.f32.vlgmr.msra.gmra.mxu0 %vm81_vm1, %v315_v53 }
 0x4e3   :  { %v335_v59 = vpop.f32.mrf.mxu0 }
 0x4e4   :  { %v339_v60 = vrot.slane %v335_v59, 1 }
 0x4e6   :  { %v341_v61 = vadd.f32 %v339_v60, %v617_v16 }
 0x4e8   :  { %453 = vtanh.f32 %v341_v61 }
 0x4ee   :  { %v454_v62 = vpop.eup %453 }
 0x4ef   :  { %v355_v63 = vsel %vm354_vm8, %v353_v54, %v454_v62 }
 0x4f0   :  { %428 = vmatmul.msk.f32.vlgmr.msra.gmra.mxu1 %vm81_vm1, %v355_v63 }
 0x56d   :  { %v387_v1 = vpop.f32.mrf.mxu1 }
 0x56e   :  { %v388_v2 = vadd.f32 %v438_v0, %v387_v1 }
 0x570   :  { %390 = vst.msk [vmem:[#allocation8] sm:$0xff] %vm81_vm1, %v388_v2 }
 0x571   :  { %401 = dma.vmem_to_hbm [thread:$0]  %s397_s11, 128, %s399_s14, [#allocation4]  }
 0x572   :  { %555 = dma.done.wait [#allocation4], 128  }
 0x573   :  { %556 = vsyncadd [#allocation4], 4294967168 }
 0x574   :  { %406 = vsyncpa [#allocation3], 1 }
 0x575   :  { %407 = vsyncpa [#allocation6], 1 }
 0x576   :  { %408 = vsyncpa [#allocation4], 1 }

</bundles_post_ra>
